<compile_context>
chip_gen: v7x
topology: tpu7x:2x2x1
jax: 0.10.0
libtpu: 0.0.40
codegen_flags: <defaults>
</compile_context>

<pallas_src>
import functools

import jax
import jax.numpy as jnp
from jax import lax
from jax.experimental import pallas as pl
from jax.experimental.pallas import tpu as pltpu
import numpy as np


def _round_up(x, m):
    return (x + m - 1) // m * m


def _cce_dist_kernel(pp, nk, x_ref, x2_ref, p_ref, p2_ref,
                     d2_ref, idx_ref, acc_ref):
    """One grid step == one (class-tile, batch-tile, feature-tile) triple.

    pp      : int (static)      padded prototypes-per-class
    nk      : int (static)      number of feature tiles
    x_ref   : (Bt, Fk)    bf16  batch tile of outputs (feature chunk)
    x2_ref  : (1, Bt)     f32   precomputed ||x||^2 (class-/feature-invariant)
    p_ref   : (R, Fk)     bf16  flattened prototypes of TC classes (R = TC*Pp)
    p2_ref  : (R, 1)      f32   precomputed ||p||^2 (padded slots = 1e30)
    d2_ref  : (TC, Bt)    f32   min squared distance per (class, sample)
    idx_ref : (TC, Bt)    i32   argmin prototype index per (class, sample)
    acc_ref : (R, Bt)     f32   scratch accumulator for p . x over feature tiles
    """
    k = pl.program_id(2)

    @pl.when(k == 0)
    def _init():
        acc_ref[...] = jnp.zeros_like(acc_ref)

    # Single MXU matmul per feature chunk: prototypes x outputs^T.
    acc_ref[...] += lax.dot_general(
        p_ref[...], x_ref[...], (((1,), (1,)), ((), ())),
        preferred_element_type=jnp.float32)                     # (R, Bt) f32

    @pl.when(k == nk - 1)
    def _fin():
        xp = acc_ref[...]
        # Squared distances: ||p||^2 + ||x||^2 - 2 p.x (norms precomputed, f32).
        d2 = p2_ref[...] + x2_ref[...] - 2.0 * xp               # (R, Bt)
        d2 = jnp.maximum(d2, 0.0)                               # sign bit clear

        tc, bt = d2_ref.shape
        nbits = max(1, (pp - 1).bit_length())
        lowmask = (1 << nbits) - 1

        # Fused min+argmin: for nonnegative f32, the int32 bit pattern is
        # order-preserving; stash the prototype index in the low mantissa bits
        # and do ONE sublane min over the prototype axis. Ties -> lowest index
        # (first occurrence, matching torch.min).
        bits = pltpu.bitcast(d2, jnp.int32)
        keys = (bits & jnp.int32(~lowmask)).reshape(tc, pp, bt)
        keys = keys | lax.broadcasted_iota(jnp.int32, (tc, pp, bt), 1)
        kmin = jnp.min(keys, axis=1)                            # (TC, Bt)

        idx_ref[...] = kmin & jnp.int32(lowmask)
        d2_ref[...] = pltpu.bitcast(kmin & jnp.int32(~lowmask), jnp.float32)


def cce_min_distances(outputs, protos, *, bt=512, mxu_rows=256,
                      matmul_dtype=jnp.bfloat16,
                      vmem_budget=40 * 1024 * 1024):
    """Returns (min_d2, min_idx), each (C, B): per-class closest-prototype
    squared Euclidean distance and prototype index for every sample."""
    B, F = outputs.shape
    C, P, _ = protos.shape
    esize = jnp.dtype(matmul_dtype).itemsize

    # ---- padded / tiled sizes (every block (8,128)-aligned or full-extent) ---
    Pp = _round_up(P, 8)                         # prototypes -> sublane tile
    if F <= 2048:                                # feature (K) tiling for big F
        Fk = _round_up(F, 128)
        nk = 1
    else:
        Fk = 2048
        nk = _round_up(F, Fk) // Fk
    Fp = Fk * nk

    Bt = min(_round_up(bt, 128), _round_up(B, 128))
    Bp = _round_up(B, Bt)

    def step_bytes(rows, tc):
        # 2x double-buffered streamed inputs + outputs + f32 accumulator.
        return (2 * Bt * Fk * esize + 2 * Bt * 4
                + 2 * rows * Fk * esize + 2 * rows * 4
                + 2 * 2 * tc * Bt * 4
                + rows * Bt * 4)

    # Class tiling: keep the whole prototype set resident when it fits in half
    # the budget (DMA'd once, only the batch streams); otherwise tile classes
    # so the matmul has ~mxu_rows rows.
    if nk == 1 and step_bytes(C * Pp, C) <= vmem_budget // 2:
        TC, Cp = C, C
    else:
        tc0 = max(1, -(-mxu_rows // Pp))
        if tc0 >= C:
            TC, Cp = C, C
        else:
            TC = _round_up(tc0, 8)
            Cp = _round_up(C, TC)
    rows = TC * Pp
    nb, nc = Bp // Bt, Cp // TC

    # ---- pad & precompute norms in f32, cast matmul operands to bf16 --------
    x_pad = jnp.pad(outputs.astype(jnp.float32), ((0, Bp - B), (0, Fp - F)))
    p_pad = jnp.pad(protos.astype(jnp.float32),
                    ((0, Cp - C), (0, Pp - P), (0, Fp - F)))

    x2 = jnp.sum(x_pad * x_pad, axis=-1)[None, :]               # (1, Bp)  f32
    p2 = jnp.sum(p_pad * p_pad, axis=-1)                        # (Cp, Pp) f32
    if Pp > P:                                   # padded prototype slots never win
        p2 = p2.at[:, P:].set(jnp.float32(1e30))
    if Cp > C:                                   # padded class rows never win
        p2 = p2.at[C:, :].set(jnp.float32(1e30))
    p2 = p2.reshape(Cp * Pp, 1)

    x_in = x_pad.astype(matmul_dtype)
    p_in = p_pad.reshape(Cp * Pp, Fp).astype(matmul_dtype)

    # ---- grid order: re-stream the smaller operand; multi-tile axis first ---
    x_bytes = Bp * Fp * esize
    p_bytes = Cp * Pp * Fp * esize
    if nb == 1 and nc > 1:
        class_major = True                       # v7x megacore: >=2 tiles on axis 0
    elif nc == 1 and nb > 1:
        class_major = False
    else:
        class_major = x_bytes <= p_bytes         # re-stream the smaller stream

    if class_major:
        grid = (nc, nb, nk)
        x_map = lambda c, b, k: (b, k)
        x2_map = lambda c, b, k: (0, b)
        p_map = lambda c, b, k: (c, k)
        p2_map = lambda c, b, k: (c, 0)
        o_map = lambda c, b, k: (c, b)
    else:
        grid = (nb, nc, nk)
        x_map = lambda b, c, k: (b, k)
        x2_map = lambda b, c, k: (0, b)
        p_map = lambda b, c, k: (c, k)
        p2_map = lambda b, c, k: (c, 0)
        o_map = lambda b, c, k: (c, b)

    vmem_limit = int(min(max(2 * step_bytes(rows, TC), 32 << 20), 64 << 20))

    kernel = functools.partial(_cce_dist_kernel, Pp, nk)

    mind2, minidx = pl.pallas_call(
        kernel,
        out_shape=(
            jax.ShapeDtypeStruct((Cp, Bp), jnp.float32),
            jax.ShapeDtypeStruct((Cp, Bp), jnp.int32),
        ),
        grid_spec=pltpu.PrefetchScalarGridSpec(
            num_scalar_prefetch=0,
            grid=grid,
            in_specs=[
                pl.BlockSpec((Bt, Fk), x_map),
                pl.BlockSpec((1, Bt), x2_map),
                pl.BlockSpec((rows, Fk), p_map),
                pl.BlockSpec((rows, 1), p2_map),
            ],
            out_specs=[
                pl.BlockSpec((TC, Bt), o_map),
                pl.BlockSpec((TC, Bt), o_map),
            ],
            scratch_shapes=[pltpu.VMEM((rows, Bt), jnp.float32)],
        ),
        compiler_params=pltpu.CompilerParams(
            dimension_semantics=("parallel", "parallel", "arbitrary"),
            vmem_limit_bytes=vmem_limit),
    )(x_in, x2, p_in, p2)

    return mind2[:C, :B], minidx[:C, :B]         # (C, B), (C, B)


def cce_forward(outputs, target_classes, protos, alpha=5.0, beta=5.0):
    """Reproduces CCE.forward.  outputs: (B, F) f32, target_classes: (B,) i32,
    protos: (C, P, F) f32.  Returns (loss_scalar, actual_closest_prototypes)."""
    B, F = outputs.shape

    # Hot path (per-class cdist + min/argmin over prototypes) in the kernel.
    min_d2, min_idx = cce_min_distances(outputs, protos)        # (C, B)

    out_idx = jnp.arange(B)
    actual_prot_idx = min_idx[target_classes, out_idx]          # (B,)
    actual_closest = protos[target_classes, actual_prot_idx]    # (B, F)

    # Wrong-class bookkeeping (computed by the module, unused in the loss).
    # argmin over squared distances == argmin over distances, so sqrt is skipped.
    d2_masked = min_d2.at[target_classes, out_idx].set(jnp.inf)
    wrong_class = jnp.argmin(d2_masked, axis=0)                 # (B,)
    wrong_prot_idx = min_idx[wrong_class, out_idx]
    _wrong_closest = protos[wrong_class, wrong_prot_idx]        # (B, F)

    target_loss = jnp.mean((outputs - actual_closest) ** 2)     # MSELoss
    non_target_loss = target_loss                                # as in the module
    loss = alpha * target_loss + beta * (1.0 - non_target_loss)
    return loss, actual_closest


def _reference(outputs, target_classes, protos, alpha=5.0, beta=5.0):
    """Pure-JAX reference mirroring the PyTorch module."""
    B = outputs.shape[0]
    diff = outputs[None, :, None, :] - protos[:, None, :, :]    # (C, B, P, F)
    dist = jnp.sqrt(jnp.sum(diff * diff, axis=-1))
    min_idx = jnp.argmin(dist, axis=-1)                          # (C, B)
    actual_prot_idx = min_idx[target_classes, jnp.arange(B)]
    actual_closest = protos[target_classes, actual_prot_idx]
    L = jnp.mean((outputs - actual_closest) ** 2)
    return alpha * L + beta * (1.0 - L)


if __name__ == "__main__":
    # Small deterministic setup: 3 classes, 8 prototypes each, 32 features, batch 8.
    B, F, C, P = 8, 32, 3, 8
    alpha, beta = 5.0, 5.0

    key = jax.random.PRNGKey(0)
    k_out, k_prot, k_tgt = jax.random.split(key, 3)

    outputs = jax.random.normal(k_out, (B, F), dtype=jnp.float32)
    protos = jax.random.normal(k_prot, (C, P, F), dtype=jnp.float32)  # clusters dict, densified
    target_classes = jax.random.randint(k_tgt, (B,), 0, C, dtype=jnp.int32)

    loss, actual_closest = cce_forward(outputs, target_classes, protos,
                                       alpha=alpha, beta=beta)
    loss = jax.block_until_ready(loss)
    jax.block_until_ready(actual_closest)

    ref_loss = _reference(outputs, target_classes, protos, alpha=alpha, beta=beta)
    np.testing.assert_allclose(np.asarray(loss), np.asarray(ref_loss),
                               rtol=1e-4, atol=1e-4)

    print("KERNEL_OK")
</pallas_src>

<mosaic_0001>
module attributes {stable_mosaic.version = 11 : i64} {
  func.func @_cce_dist_kernel(%arg0: i32, %arg1: i32, %arg2: i32, %arg3: memref<128x128xbf16, #tpu.memory_space<vmem>>, %arg4: memref<1x128xf32, #tpu.memory_space<vmem>>, %arg5: memref<24x128xbf16, #tpu.memory_space<vmem>>, %arg6: memref<24x1xf32, #tpu.memory_space<vmem>>, %arg7: memref<3x128xf32, #tpu.memory_space<vmem>>, %arg8: memref<3x128xi32, #tpu.memory_space<vmem>>, %arg9: memref<24x128xf32, #tpu.memory_space<vmem>>) attributes {dimension_semantics = [#tpu.dimension_semantics<parallel>, #tpu.dimension_semantics<parallel>, #tpu.dimension_semantics<arbitrary>], iteration_bounds = array<i64: 1, 1, 1>, scalar_prefetch = 0 : i64, scratch_operands = 1 : i64, tpu.core_type = #tpu.core_type<tc>, window_params = [{transform_indices = @transform_0, window_bounds = array<i64: 128, 128>}, {transform_indices = @transform_1, window_bounds = array<i64: 1, 128>}, {transform_indices = @transform_2, window_bounds = array<i64: 24, 128>}, {transform_indices = @transform_3, window_bounds = array<i64: 24, 1>}, {transform_indices = @transform_4, window_bounds = array<i64: 3, 128>}, {transform_indices = @transform_5, window_bounds = array<i64: 3, 128>}]} {
    %c0_i32 = arith.constant 0 : i32
    %0 = arith.cmpi eq, %arg2, %c0_i32 : i32
    %1 = arith.extui %0 : i1 to i32
    %c0_i32_0 = arith.constant 0 : i32
    %2 = arith.cmpi ne, %1, %c0_i32_0 : i32
    scf.if %2 {
      %cst_10 = arith.constant 0.000000e+00 : f32
      %12 = vector.broadcast %cst_10 : f32 to vector<24x128xf32>
      %c0_11 = arith.constant 0 : index
      %c0_12 = arith.constant 0 : index
      %13 = vector.load %arg9[%c0_11, %c0_12] : memref<24x128xf32, #tpu.memory_space<vmem>>, vector<24x128xf32>
      tpu.vector_store %arg9[%c0_11, %c0_12], %12 {strides = array<i32>} : memref<24x128xf32, #tpu.memory_space<vmem>>, vector<24x128xf32>,
    } else {
    }
    %c0 = arith.constant 0 : index
    %c0_1 = arith.constant 0 : index
    %3 = vector.load %arg9[%c0, %c0_1] : memref<24x128xf32, #tpu.memory_space<vmem>>, vector<24x128xf32>
    %c0_2 = arith.constant 0 : index
    %c0_3 = arith.constant 0 : index
    %4 = vector.load %arg5[%c0_2, %c0_3] : memref<24x128xbf16, #tpu.memory_space<vmem>>, vector<24x128xbf16>
    %c0_4 = arith.constant 0 : index
    %c0_5 = arith.constant 0 : index
    %5 = vector.load %arg3[%c0_4, %c0_5] : memref<128x128xbf16, #tpu.memory_space<vmem>>, vector<128x128xbf16>
    %cst = arith.constant dense<0.000000e+00> : vector<24x128xf32>
    %6 = tpu.matmul %4, %5, %cst {dimension_numbers = #tpu.dot_dimension_numbers<[1], [1], [0], [0], [0, 0, 1, 0], [], []>} : vector<24x128xbf16>, vector<128x128xbf16>, vector<24x128xf32> -> vector<24x128xf32>
    %7 = arith.addf %3, %6 : vector<24x128xf32>
    %c0_6 = arith.constant 0 : index
    %c0_7 = arith.constant 0 : index
    %8 = vector.load %arg9[%c0_6, %c0_7] : memref<24x128xf32, #tpu.memory_space<vmem>>, vector<24x128xf32>
    tpu.vector_store %arg9[%c0_6, %c0_7], %7 {strides = array<i32>} : memref<24x128xf32, #tpu.memory_space<vmem>>, vector<24x128xf32>,
    %c0_i32_8 = arith.constant 0 : i32
    %9 = arith.cmpi eq, %arg2, %c0_i32_8 : i32
    %10 = arith.extui %9 : i1 to i32
    %c0_i32_9 = arith.constant 0 : i32
    %11 = arith.cmpi ne, %10, %c0_i32_9 : i32
    scf.if %11 {
      %c0_10 = arith.constant 0 : index
      %c0_11 = arith.constant 0 : index
      %12 = vector.load %arg9[%c0_10, %c0_11] : memref<24x128xf32, #tpu.memory_space<vmem>>, vector<24x128xf32>
      %c0_12 = arith.constant 0 : index
      %c0_13 = arith.constant 0 : index
      %13 = vector.load %arg6[%c0_12, %c0_13] : memref<24x1xf32, #tpu.memory_space<vmem>>, vector<24x1xf32>
      %c0_14 = arith.constant 0 : index
      %c0_15 = arith.constant 0 : index
      %14 = vector.load %arg4[%c0_14, %c0_15] : memref<1x128xf32, #tpu.memory_space<vmem>>, vector<1x128xf32>
      %15 = vector.broadcast %13 : vector<24x1xf32> to vector<24x128xf32>
      %16 = vector.broadcast %14 : vector<1x128xf32> to vector<24x128xf32>
      %17 = arith.addf %15, %16 : vector<24x128xf32>
      %cst_16 = arith.constant 2.000000e+00 : f32
      %18 = vector.broadcast %cst_16 : f32 to vector<24x128xf32>
      %19 = arith.mulf %18, %12 : vector<24x128xf32>
      %20 = arith.subf %17, %19 : vector<24x128xf32>
      %cst_17 = arith.constant 0.000000e+00 : f32
      %21 = vector.broadcast %cst_17 : f32 to vector<24x128xf32>
      %22 = arith.maximumf %20, %21 : vector<24x128xf32>
      %23 = tpu.bitcast %22 : vector<24x128xf32> -> vector<24x128xi32>
      %c-8_i32 = arith.constant -8 : i32
      %24 = vector.broadcast %c-8_i32 : i32 to vector<24x128xi32>
      %25 = arith.andi %23, %24 : vector<24x128xi32>
      %26 = vector.shape_cast %25 : vector<24x128xi32> to vector<3x8x128xi32>
      %27 = tpu.iota {dimensions = array<i32: 1>} : vector<3x8x128xi32>
      %28 = arith.ori %26, %27 : vector<3x8x128xi32>
      %cst_18 = arith.constant dense<2147483647> : vector<3x128xi32>
      %29 = vector.multi_reduction <minsi>, %28, %cst_18 [1] : vector<3x8x128xi32> to vector<3x128xi32>
      %c7_i32 = arith.constant 7 : i32
      %30 = vector.broadcast %c7_i32 : i32 to vector<3x128xi32>
      %31 = arith.andi %29, %30 : vector<3x128xi32>
      %c0_19 = arith.constant 0 : index
      %c0_20 = arith.constant 0 : index
      %32 = vector.load %arg8[%c0_19, %c0_20] : memref<3x128xi32, #tpu.memory_space<vmem>>, vector<3x128xi32>
      tpu.vector_store %arg8[%c0_19, %c0_20], %31 {strides = array<i32>} : memref<3x128xi32, #tpu.memory_space<vmem>>, vector<3x128xi32>,
      %c-8_i32_21 = arith.constant -8 : i32
      %33 = vector.broadcast %c-8_i32_21 : i32 to vector<3x128xi32>
      %34 = arith.andi %29, %33 : vector<3x128xi32>
      %35 = tpu.bitcast %34 : vector<3x128xi32> -> vector<3x128xf32>
      %c0_22 = arith.constant 0 : index
      %c0_23 = arith.constant 0 : index
      %36 = vector.load %arg7[%c0_22, %c0_23] : memref<3x128xf32, #tpu.memory_space<vmem>>, vector<3x128xf32>
      tpu.vector_store %arg7[%c0_22, %c0_23], %35 {strides = array<i32>} : memref<3x128xf32, #tpu.memory_space<vmem>>, vector<3x128xf32>,
    } else {
    }
    return
  }
  func.func @transform_0(%arg0: i32, %arg1: i32, %arg2: i32) -> (i32, i32) {
    %c0_i32 = arith.constant 0 : i32
    return %arg0, %arg2 : i32, i32
  }
  func.func @transform_1(%arg0: i32, %arg1: i32, %arg2: i32) -> (i32, i32) {
    %c0_i32 = arith.constant 0 : i32
    %c0_i32_0 = arith.constant 0 : i32
    return %c0_i32, %arg0 : i32, i32
  }
  func.func @transform_2(%arg0: i32, %arg1: i32, %arg2: i32) -> (i32, i32) {
    %c0_i32 = arith.constant 0 : i32
    return %arg1, %arg2 : i32, i32
  }
  func.func @transform_3(%arg0: i32, %arg1: i32, %arg2: i32) -> (i32, i32) {
    %c0_i32 = arith.constant 0 : i32
    %c0_i32_0 = arith.constant 0 : i32
    return %arg1, %c0_i32 : i32, i32
  }
  func.func @transform_4(%arg0: i32, %arg1: i32, %arg2: i32) -> (i32, i32) {
    %c0_i32 = arith.constant 0 : i32
    return %arg1, %arg0 : i32, i32
  }
  func.func @transform_5(%arg0: i32, %arg1: i32, %arg2: i32) -> (i32, i32) {
    %c0_i32 = arith.constant 0 : i32
    return %arg1, %arg0 : i32, i32
  }
}

</mosaic_0001>

<bundles_post_ra>
// kernel: tpu_custom_call.1
= control target key start
LH: loop header
LB: loop body
LE: loop exit
PB: predicated region body
PF: predicated region fallthrough
CT: control target
= control target key end

     0   :  { %11 = vsyncpa [#allocation4], 0  ;;  %s523_s0 = inlined_call_operand.hbm [shape: bf16[128,128], index: 0, kind: input, shape index: {}]   ;;  %s524_s1 = inlined_call_operand.vmem [shape: f32[1,128], index: 1, kind: input, shape index: {}]   ;;  %s525_s2 = inlined_call_operand.vmem [shape: bf16[24,128], index: 2, kind: input, shape index: {}]   ;;  %s526_s3 = inlined_call_operand.vmem [shape: f32[24,1], index: 3, kind: input, shape index: {}]   ;;  %s527_s4 = inlined_call_operand.hbm [shape: f32[3,128], index: 4, kind: output, shape index: {0}]   ;;  %s528_s5 = inlined_call_operand.hbm [shape: s32[3,128], index: 5, kind: output, shape index: {1}]  }
   0x1   :  { %12 = vsyncpa [#allocation5], 0 }
   0x2   :  { %13 = vsyncpa [#allocation8], 0  ;;  %s433_s18 = smov [#allocation3]   ;;  %s361_s22 = scalar_lea.hbm %s523_s0, 1024 }
   0x3   :  { %s19_s19 = sshll.u32 %s433_s18, 4  ;;  %p362_p0 = scmp.ne.s32.totalorder %s523_s0, %s361_s22  ;;  %s20_s19 = int_to_ptr.vmem [resolvable:$true] %s19_s19 }
   0x4   :  { %p365_p1 = scmp.lt.u32.totalorder %s361_s22, %s523_s0 }
   0x6   :  { %p367_p2 = pnand %p365_p1, %p362_p0 }
   0x8   :  { %370 = shalt.err (!%p367_p2)
}
   0x9   :  { %s371_s27 = scalar_lea.vmem %s20_s19, 1024  ;;  %p376_p4 = scmp.lt.s32.totalorder %s20_s19, %s20_s19 }
   0xa   :  { %p372_p3 = scmp.ne.s32.totalorder %s20_s19, %s371_s27  ;;  %p377_p5 = scmp.lt.s32.totalorder %s371_s27, %s371_s27 }
   0xc   :  { %p378_p6 = por %p377_p5, %p376_p4 }
   0xe   :  { %p379_p7 = pnand %p378_p6, %p372_p3 }
  0x10   :  { %382 = shalt.err (!%p379_p7)
}
  0x11   :  { %s434_s28 = smov 64   ;;  %s435_s29 = smov 4  }
  0x12   :  { %25 = dma.hbm_to_vmem [thread:$0]  %s523_s0, 1024, %s20_s19, [#allocation4], %s434_s28, %s434_s28, %s435_s29  }
  0x13   :  { %427 = dma.done.wait [#allocation4], 1024  }
  0x14   :  { %428 = vsyncadd [#allocation4], 4294966272  ;;  %v436_v0 = vmov 0   ;;  %v351_v1 = vld [vmem:[#allocation3] sm:$0xff]   ;;  %v352_v2 = vld [vmem:[#allocation3 + $0x8] sm:$0xff]   ;;  %v226_v21 = vlaneseq  ;;  %vm261_vm9 = vcmask 1041409  }
  0x15   :  { %349 = vset.pattern.permute.xlu0 %v436_v0  ;;  %350 = vset.pattern.permute.xlu1 %v436_v0  ;;  %v353_v3 = vld [vmem:[#allocation3 + $0x10] sm:$0xff]   ;;  %v359_v4 = vld [vmem:[%s525_s2] sm:$0xff]   ;;  %v184_v7 = vld [vmem:[%s526_s3 + $0x8] sm:$0xff]  ;;  %vm263_vm10 = vcmask 1042434   ;;  %s438_s17 = smov [#allocation7]  }
  0x16   :  { %323 = vmatprep.subr.bf16.mxu0 %v351_v1  ;;  %v183_v5 = vld [vmem:[%s526_s3] sm:$0xff]  ;;  %339 = vmatprep.mubr.bf16.mxu0 %v359_v4  ;;  %v185_v6 = vld [vmem:[%s526_s3 + $0x10] sm:$0xff]  ;;  %v354_v8 = vld [vmem:[#allocation3 + $0x18] sm:$0xff]   ;;  %v227_v32 = vshrl.u32 %v226_v21, 7  ;;  %s289_s18 = sshll.u32 %s438_s17, 4  ;;  %s290_s18 = int_to_ptr.vmem [resolvable:$true] %s289_s18 }
  0x17   :  { %324 = vmatpush3.bf16.xpose.msra.mxu0 %v351_v1  ;;  %189 = vperm.xlu0 %349, %v183_v5   ;;  %v355_v9 = vld [vmem:[#allocation3 + $0x20] sm:$0xff]   ;;  %v356_v10 = vld [vmem:[#allocation3 + $0x28] sm:$0xff]   ;;  %v357_v11 = vld [vmem:[#allocation3 + $0x30] sm:$0xff]  }
  0x18   :  { %325 = vmatprep.subr.bf16.mxu0 %v352_v2  ;;  %199 = vperm.xlu1 %350, %v185_v6   ;;  %v358_v12 = vld [vmem:[#allocation3 + $0x38] sm:$0xff]   ;;  %v360_v13 = vld [vmem:[%s525_s2 + $0x8] ss:$0 sps:$4 sm:$0xff]   ;;  %v312_v15 = vld [vmem:[%s524_s1] ss:$0 sm:$0xff]  ;;  %s437_s1 = smov [#allocation6]  }
  0x19   :  { %s279_s2 = sshll.u32 %s437_s1, 4  ;;  %s280_s2 = int_to_ptr.vmem [resolvable:$true] %s279_s2 }
  0x1a   :  { %s383_s19 = scalar_lea.vmem %s280_s2, 64  ;;  %p388_p9 = scmp.lt.s32.totalorder %s280_s2, %s280_s2 }
  0x1b   :  { %194 = vperm.xlu0 %349, %v184_v7   ;;  %p384_p8 = scmp.ne.s32.totalorder %s280_s2, %s383_s19  ;;  %p389_p10 = scmp.lt.s32.totalorder %s383_s19, %s383_s19 }
  0x1d   :  { %p390_p11 = por %p389_p10, %p388_p9 }
  0x1f   :  { %326 = vmatpush3.bf16.xpose.msra.mxu0 %v352_v2  ;;  %p391_p12 = pnand %p390_p11, %p384_p8 }
  0x20   :  { %327 = vmatprep.subr.bf16.mxu0 %v353_v3 }
  0x27   :  { %328 = vmatpush3.bf16.xpose.msra.mxu0 %v353_v3 }
  0x28   :  { %329 = vmatprep.subr.bf16.mxu0 %v354_v8 }
  0x2f   :  { %330 = vmatpush3.bf16.xpose.msra.mxu0 %v354_v8 }
  0x30   :  { %331 = vmatprep.subr.bf16.mxu0 %v355_v9 }
  0x37   :  { %332 = vmatpush3.bf16.xpose.msra.mxu0 %v355_v9 }
  0x38   :  { %333 = vmatprep.subr.bf16.mxu0 %v356_v10 }
  0x3f   :  { %334 = vmatpush3.bf16.xpose.msra.mxu0 %v356_v10 }
  0x40   :  { %335 = vmatprep.subr.bf16.mxu0 %v357_v11 }
  0x47   :  { %336 = vmatpush3.bf16.xpose.msra.mxu0 %v357_v11 }
  0x48   :  { %337 = vmatprep.subr.bf16.mxu0 %v358_v12 }
  0x4f   :  { %338 = vmatpush3.bf16.xpose.msra.mxu0 %v358_v12 }
  0x56   :  { %340 = vmatmul.mubr.bf16.vlgmr.msra.gmra.mrb[0].mxu0 %v360_v13 }
  0x96   :  { %v190_v14 = vpop.permute.xlu0 %189 }
  0x97   :  { %v200_v16 = vpop.permute.xlu1 %199  ;;  %v208_v23 = vadd.f32 %v312_v15, %v190_v14 }
  0x98   :  { %v210_v17 = vadd.f32 %v312_v15, %v200_v16 }
  0x9a   :  { %v195_v19 = vpop.permute.xlu0 %194 }
  0x9b   :  { %v209_v28 = vadd.f32 %v312_v15, %v195_v19 }
 0x129   :  { %v341_v18 = vpop.f32.mrb[0].mxu0 }
 0x12a   :  { %v213_v20 = vmul.f32 2.0, %v341_v18  ;;  %v157_v22 = vpop.f32.mrb[1].mxu0 }
 0x12b   :  { %v211_v24 = vmul.f32 2.0, %v157_v22  ;;  %v342_v25 = vpop.f32.mrb[2].mxu0 }
 0x12c   :  { %v216_v26 = vsub.f32 %v210_v17, %v213_v20  ;;  %v160_v27 = vpop.f32.mrb[3].mxu0 }
 0x12d   :  { %v214_v29 = vsub.f32 %v208_v23, %v211_v24  ;;  %v212_v30 = vmul.f32 2.0, %v160_v27 }
 0x12e   :  { %v219_v31 = vmax.f32 %v216_v26, 0.0 }
 0x12f   :  { %v217_v33 = vmax.f32 %v214_v29, 0.0  ;;  %v215_v34 = vsub.f32 %v209_v28, %v212_v30 }
 0x130   :  { %v225_v35 = vand.u32 4294967288, %v219_v31 }
 0x131   :  { %v223_v36 = vand.u32 4294967288, %v217_v33  ;;  %v218_v37 = vmax.f32 %v215_v34, 0.0 }
 0x132   :  { %v230_v38 = vor.u32 %v227_v32, %v225_v35 }
 0x133   :  { %v228_v39 = vor.u32 %v227_v32, %v223_v36  ;;  %v224_v40 = vand.u32 4294967288, %v218_v37 }
 0x134   :  { %v249_v41 = vrot.slane %v230_v38, 4 }
 0x135   :  { %v231_v42 = vrot.slane %v228_v39, 4  ;;  %v229_v43 = vor.u32 %v227_v32, %v224_v40 }
 0x136   :  { %vm250_vm0 = vcmp.lt.s32.totalorder %v230_v38, %v249_v41 }
 0x137   :  { %v251_v44 = vsel %vm250_vm0, %v230_v38, %v249_v41  ;;  %vm232_vm1 = vcmp.lt.s32.totalorder %v228_v39, %v231_v42  ;;  %v240_v45 = vrot.slane %v229_v43, 4 }
 0x138   :  { %v252_v46 = vrot.slane %v251_v44, 2  ;;  %v233_v47 = vsel %vm232_vm1, %v228_v39, %v231_v42 }
 0x139   :  { %v234_v48 = vrot.slane %v233_v47, 2  ;;  %vm241_vm2 = vcmp.lt.s32.totalorder %v229_v43, %v240_v45 }
 0x13a   :  { %vm253_vm3 = vcmp.lt.s32.totalorder %v251_v44, %v252_v46  ;;  %v242_v49 = vsel %vm241_vm2, %v229_v43, %v240_v45 }
 0x13b   :  { %vm235_vm4 = vcmp.lt.s32.totalorder %v233_v47, %v234_v48  ;;  %v243_v50 = vrot.slane %v242_v49, 2  ;;  %v254_v51 = vsel %vm253_vm3, %v251_v44, %v252_v46 }
 0x13c   :  { %v236_v52 = vsel %vm235_vm4, %v233_v47, %v234_v48  ;;  %v255_v53 = vrot.slane %v254_v51, 1 }
 0x13d   :  { %v237_v54 = vrot.slane %v236_v52, 1  ;;  %vm244_vm5 = vcmp.lt.s32.totalorder %v242_v49, %v243_v50 }
 0x13e   :  { %v245_v55 = vsel %vm244_vm5, %v242_v49, %v243_v50  ;;  %vm256_vm6 = vcmp.lt.s32.totalorder %v254_v51, %v255_v53 }
 0x13f   :  { %v246_v56 = vrot.slane %v245_v55, 1  ;;  %vm238_vm7 = vcmp.lt.s32.totalorder %v236_v52, %v237_v54  ;;  %v257_v58 = vsel %vm256_vm6, %v254_v51, %v255_v53 }
 0x140   :  { %v239_v57 = vsel %vm238_vm7, %v236_v52, %v237_v54  ;;  %v268_v0 = vand.u32 4294967288, %v257_v58  ;;  %v260_v1 = vand.u32 7, %v257_v58 }
 0x141   :  { %vm247_vm8 = vcmp.lt.s32.totalorder %v245_v55, %v246_v56  ;;  %v266_v60 = vand.u32 4294967288, %v239_v57  ;;  %v258_v62 = vand.u32 7, %v239_v57 }
 0x142   :  { %v248_v59 = vsel %vm247_vm8, %v245_v55, %v246_v56 }
 0x143   :  { %v267_v61 = vand.u32 4294967288, %v248_v59  ;;  %v259_v63 = vand.u32 7, %v248_v59 }
 0x145   :  { %v269_v2 = vsel %vm261_vm9, %v267_v61, %v266_v60  ;;  %v262_v3 = vsel %vm261_vm9, %v259_v63, %v258_v62 }
 0x146   :  { %v270_v4 = vsel %vm263_vm10, %v268_v0, %v269_v2  ;;  %v264_v5 = vsel %vm263_vm10, %v260_v1, %v262_v3 }
 0x147   :  { %272 = vst [vmem:[#allocation6] sm:$0x7] %v270_v4  ;;  %265 = vst [vmem:[#allocation7] sm:$0x7] %v264_v5 }
 0x148   :  { %394 = shalt.err (!%p391_p12)
}
 0x149   :  { %s395_s22 = scalar_lea.hbm %s527_s4, 64 }
 0x14a   :  { %p396_p13 = scmp.ne.s32.totalorder %s527_s4, %s395_s22  ;;  %p399_p0 = scmp.lt.u32.totalorder %s395_s22, %s527_s4 }
 0x14c   :  { %p401_p1 = pnand %p399_p0, %p396_p13 }
 0x14e   :  { %404 = shalt.err (!%p401_p1)
}
 0x14f   :  { %282 = dma.vmem_to_hbm [thread:$0]  %s280_s2, 64, %s527_s4, [#allocation5]  }
 0x150   :  { %s405_s29 = scalar_lea.vmem %s290_s18, 64  ;;  %p410_p3 = scmp.lt.s32.totalorder %s290_s18, %s290_s18 }
 0x151   :  { %p406_p2 = scmp.ne.s32.totalorder %s290_s18, %s405_s29  ;;  %p411_p4 = scmp.lt.s32.totalorder %s405_s29, %s405_s29 }
 0x153   :  { %p412_p5 = por %p411_p4, %p410_p3 }
 0x155   :  { %p413_p6 = pnand %p412_p5, %p406_p2 }
 0x157   :  { %416 = shalt.err (!%p413_p6)
}
 0x158   :  { %s417_s7 = scalar_lea.hbm %s528_s5, 64 }
 0x159   :  { %p418_p7 = scmp.ne.s32.totalorder %s528_s5, %s417_s7  ;;  %p421_p8 = scmp.lt.u32.totalorder %s417_s7, %s528_s5 }
 0x15b   :  { %p423_p9 = pnand %p421_p8, %p418_p7 }
 0x15d   :  { %426 = shalt.err (!%p423_p9)
}
 0x15e   :  { %292 = dma.vmem_to_hbm [thread:$0]  %s290_s18, 64, %s528_s5, [#allocation8]  }
 0x15f   :  { %429 = dma.done.wait [#allocation5], 64  }
 0x160   :  { %430 = vsyncadd [#allocation5], 4294967232 }
 0x161   :  { %431 = dma.done.wait [#allocation8], 64  }
 0x162   :  { %432 = vsyncadd [#allocation8], 4294967232 }
 0x163   :  { %299 = vsyncpa [#allocation4], 1 }
 0x164   :  { %300 = vsyncpa [#allocation5], 1 }
 0x165   :  { %301 = vsyncpa [#allocation8], 1 }

</bundles_post_ra>
